<compile_context>
chip_gen: v7x
topology: tpu7x:2x2x1
jax: 0.10.0
libtpu: 0.0.40
codegen_flags: <defaults>
</compile_context>

<pallas_src>
import functools

import jax
import jax.numpy as jnp
from jax.experimental import pallas as pl
from jax.experimental.pallas import tpu as pltpu


def _pick_tile(dim: int, target: int, align: int) -> int:
    """Largest multiple of `align` that divides `dim` and is <= target.
    Falls back to the full dimension (a full-extent block is always legal)."""
    if dim <= target:
        return dim
    t = (target // align) * align
    while t >= align:
        if dim % t == 0:
            return t
        t -= align
    return dim


# --------------------------------------------------------------------------- #
# Kernel 1: projection  h = x @ W,  f = h @ [a1 | a2]   (row-tiled over N)
# --------------------------------------------------------------------------- #
def _proj_kernel(x_ref, w_ref, a_ref, h_ref, f_ref):
    # x_ref: [TMp, F_in], w_ref: [F_in, F_out], a_ref: [F_out, 2]
    h = jnp.dot(x_ref[...], w_ref[...], preferred_element_type=jnp.float32)
    f_ref[...] = jnp.dot(h, a_ref[...],
                         preferred_element_type=jnp.float32).astype(f_ref.dtype)
    h_ref[...] = h.astype(h_ref.dtype)


# --------------------------------------------------------------------------- #
# Kernel 2: masked row-softmax + aggregation, tiled over the N x N matrix
# --------------------------------------------------------------------------- #
def _attn_kernel(f1_ref, f2t_ref, adj_ref, h_ref, o_ref,
                 m_sc, l_sc, acc_sc, *, alpha, concat):
    k = pl.program_id(1)

    @pl.when(k == 0)
    def _init():
        m_sc[...] = jnp.full_like(m_sc, -jnp.inf)
        l_sc[...] = jnp.zeros_like(l_sc)
        acc_sc[...] = jnp.zeros_like(acc_sc)

    # e[i, j] = LeakyReLU(a1.h_i + a2.h_j); masked where adj <= 0 (same fill
    # value as the PyTorch code).
    e = f1_ref[...] + f2t_ref[...]                      # [TM, TK] via broadcast
    e = jnp.where(e > 0, e, alpha * e)                  # LeakyReLU(alpha)
    e = jnp.where(adj_ref[...] > 0, e, -9.0e15)

    # Online softmax over the neighbor (column) axis.
    m_prev = m_sc[...]
    m_new = jnp.maximum(m_prev, jnp.max(e, axis=-1, keepdims=True))
    corr = jnp.exp(m_prev - m_new)
    p = jnp.exp(e - m_new)
    l_sc[...] = corr * l_sc[...] + jnp.sum(p, axis=-1, keepdims=True)
    acc_sc[...] = corr * acc_sc[...] + jnp.dot(
        p, h_ref[...].astype(jnp.float32), preferred_element_type=jnp.float32)
    m_sc[...] = m_new

    @pl.when(k == pl.num_programs(1) - 1)
    def _finalize():
        h_prime = acc_sc[...] / l_sc[...]
        # TODO(synk): training-time attention dropout (pltpu.prng_random_bits) is not
        # implemented; this matches the module in eval mode / dropout == 0.
        if concat:
            # ELU(x) = x if x > 0 else exp(x) - 1
            h_prime = jnp.where(h_prime > 0.0, h_prime,
                                jnp.exp(jnp.minimum(h_prime, 0.0)) - 1.0)
        o_ref[...] = h_prime.astype(o_ref.dtype)


# --------------------------------------------------------------------------- #
# Wrapper
# --------------------------------------------------------------------------- #
def graph_attention_layer(x, adj, W, a1, a2, *, alpha=0.2, concat=True,
                          dropout=0.0, row_tile=256, col_tile=512):
    """Pallas GAT layer (inference): ELU(softmax_row(mask(LeakyReLU(...))) @ (x @ W)).

    `adj` is only compared against 0, so passing it (or a precomputed {0,1} mask)
    as bfloat16 / int8 halves / quarters the dominant HBM stream with identical
    results.
    """
    N, F_in = x.shape
    F_out = W.shape[1]
    assert adj.shape == (N, N)
    del dropout  # inference path; see TODO in the kernel.

    # ---- 1) projection: h = x @ W, f = h @ [a1 | a2] ------------------------
    tmp = _pick_tile(N, 256, 8)
    A = jnp.concatenate([a1, a2], axis=1)               # [F_out, 2]
    h, f = pl.pallas_call(
        _proj_kernel,
        out_shape=(jax.ShapeDtypeStruct((N, F_out), x.dtype),
                   jax.ShapeDtypeStruct((N, 2), jnp.float32)),
        grid_spec=pltpu.PrefetchScalarGridSpec(
            num_scalar_prefetch=0,
            grid=(N // tmp,),
            in_specs=[
                pl.BlockSpec((tmp, F_in), lambda i: (i, 0)),
                pl.BlockSpec((F_in, F_out), lambda i: (0, 0)),
                pl.BlockSpec((F_out, 2), lambda i: (0, 0)),
            ],
            out_specs=[
                pl.BlockSpec((tmp, F_out), lambda i: (i, 0)),
                pl.BlockSpec((tmp, 2), lambda i: (i, 0)),
            ],
        ),
        compiler_params=pltpu.CompilerParams(dimension_semantics=("parallel",)),
    )(x, W, A)

    f1 = f[:, :1]                                        # [N, 1]
    f2t = f[:, 1].reshape(1, N)                          # [1, N] (lane-major)

    # ---- 2) masked softmax + aggregation, tiled over the N x N matrix -------
    tm = _pick_tile(N, row_tile, 16)    # 16-aligned: legal for f32 and packed adj
    tk = _pick_tile(N, col_tile, 128)   # lane-aligned column (softmax) tiles
    n_row = N // tm
    n_col = N // tk

    cost = pl.CostEstimate(
        flops=2 * N * N * F_out + 12 * N * N,
        transcendentals=N * N + N * F_out,
        bytes_accessed=int(adj.dtype.itemsize * N * N
                           + x.dtype.itemsize * N * F_out * (n_row + 1)
                           + 4 * 2 * N * (n_col + 1)
                           + x.dtype.itemsize * N * F_out),
    )

    out = pl.pallas_call(
        functools.partial(_attn_kernel, alpha=alpha, concat=concat),
        out_shape=jax.ShapeDtypeStruct((N, F_out), x.dtype),
        grid_spec=pltpu.PrefetchScalarGridSpec(
            num_scalar_prefetch=0,
            grid=(n_row, n_col),                              # reduction axis last
            in_specs=[
                pl.BlockSpec((tm, 1), lambda i, k: (i, 0)),       # f1 row tile
                pl.BlockSpec((1, tk), lambda i, k: (0, k)),       # f2^T col tile
                pl.BlockSpec((tm, tk), lambda i, k: (i, k)),      # adj tile
                pl.BlockSpec((tk, F_out), lambda i, k: (k, 0)),   # h col tile
            ],
            out_specs=pl.BlockSpec((tm, F_out), lambda i, k: (i, 0)),
            scratch_shapes=[
                pltpu.VMEM((tm, 1), jnp.float32),      # running max
                pltpu.VMEM((tm, 1), jnp.float32),      # running denominator
                pltpu.VMEM((tm, F_out), jnp.float32),  # f32 accumulator
            ],
        ),
        compiler_params=pltpu.CompilerParams(
            dimension_semantics=("parallel", "arbitrary"),
            vmem_limit_bytes=48 * 1024 * 1024,
        ),
        cost_estimate=cost,
    )(f1, f2t, adj, h)
    return out


# --------------------------------------------------------------------------- #
# Reference + demo
# --------------------------------------------------------------------------- #
def gat_reference(x, adj, W, a1, a2, alpha=0.2, concat=True):
    hi = jax.lax.Precision.HIGHEST
    h = jnp.matmul(x, W, precision=hi)
    f1 = jnp.matmul(h, a1, precision=hi)
    f2 = jnp.matmul(h, a2, precision=hi)
    e = f1 + f2.T
    e = jnp.where(e > 0, e, alpha * e)
    att = jnp.where(adj > 0, e, -9.0e15)
    att = jax.nn.softmax(att, axis=1)
    h_prime = jnp.matmul(att, h, precision=hi)
    if concat:
        h_prime = jnp.where(h_prime > 0, h_prime,
                            jnp.expm1(jnp.minimum(h_prime, 0.0)))
    return h_prime


def xavier_uniform(key, fan_in, fan_out, gain=1.414, dtype=jnp.float32):
    bound = gain * (6.0 / (fan_in + fan_out)) ** 0.5
    return jax.random.uniform(key, (fan_in, fan_out), dtype, -bound, bound)


if __name__ == "__main__":
    def check(N, F_in, F_out, key):
        kw, k1, k2, kx, ka = jax.random.split(key, 5)
        W = xavier_uniform(kw, F_in, F_out)
        a1 = xavier_uniform(k1, F_out, 1)
        a2 = xavier_uniform(k2, F_out, 1)
        x = jax.random.normal(kx, (N, F_in), dtype=jnp.float32)
        # Binary symmetric adjacency with self-loops, stored as bf16 ({0,1} exact):
        # halves the dominant HBM stream, identical `adj > 0` semantics.
        a = jax.random.uniform(ka, (N, N))
        adj = ((a + a.T) * 0.5 > 0.55).astype(jnp.float32) + jnp.eye(N)
        adj = jnp.minimum(adj, 1.0).astype(jnp.bfloat16)

        out = graph_attention_layer(x, adj, W, a1, a2, alpha=0.2, concat=True)
        jax.block_until_ready(out)

        ref = gat_reference(x, adj.astype(jnp.float32), W, a1, a2,
                            alpha=0.2, concat=True)
        assert out.shape == (N, F_out)
        err = jnp.max(jnp.abs(out - ref))
        assert jnp.allclose(out, ref, atol=1e-4, rtol=1e-4), \
            f"mismatch vs reference at N={N}: max abs err {err}"

    key = jax.random.PRNGKey(0)
    k_small, k_big = jax.random.split(key)
    # Small demo shape (single tile per axis).
    check(16, 32, 64, k_small)
    # Larger shape exercising the (TM, TK) tiling + online-softmax accumulator.
    check(1024, 64, 128, k_big)
    print("KERNEL_OK")
</pallas_src>

<mosaic_0001>
module attributes {stable_mosaic.version = 11 : i64} {
  func.func @_proj_kernel(%arg0: i32, %arg1: memref<16x32xf32, #tpu.memory_space<vmem>>, %arg2: memref<32x64xf32, #tpu.memory_space<vmem>>, %arg3: memref<64x2xf32, #tpu.memory_space<vmem>>, %arg4: memref<16x64xf32, #tpu.memory_space<vmem>>, %arg5: memref<16x2xf32, #tpu.memory_space<vmem>>) attributes {dimension_semantics = [#tpu.dimension_semantics<parallel>], iteration_bounds = array<i64: 1>, scalar_prefetch = 0 : i64, scratch_operands = 0 : i64, tpu.core_type = #tpu.core_type<tc>, window_params = [{transform_indices = @transform_0, window_bounds = array<i64: 16, 32>}, {pipeline_mode = #tpu.pipeline_mode<synchronous>, transform_indices = @transform_1, window_bounds = array<i64: 32, 64>}, {pipeline_mode = #tpu.pipeline_mode<synchronous>, transform_indices = @transform_2, window_bounds = array<i64: 64, 2>}, {transform_indices = @transform_3, window_bounds = array<i64: 16, 64>}, {transform_indices = @transform_4, window_bounds = array<i64: 16, 2>}]} {
    %c0 = arith.constant 0 : index
    %c0_0 = arith.constant 0 : index
    %0 = vector.load %arg1[%c0, %c0_0] : memref<16x32xf32, #tpu.memory_space<vmem>>, vector<16x32xf32>
    %c0_1 = arith.constant 0 : index
    %c0_2 = arith.constant 0 : index
    %1 = vector.load %arg2[%c0_1, %c0_2] : memref<32x64xf32, #tpu.memory_space<vmem>>, vector<32x64xf32>
    %cst = arith.constant dense<0.000000e+00> : vector<16x64xf32>
    %2 = tpu.matmul %0, %1, %cst {dimension_numbers = #tpu.dot_dimension_numbers<[1], [0], [0], [1], [0, 0, 1, 1], [], []>} : vector<16x32xf32>, vector<32x64xf32>, vector<16x64xf32> -> vector<16x64xf32>
    %c0_3 = arith.constant 0 : index
    %c0_4 = arith.constant 0 : index
    %3 = vector.load %arg3[%c0_3, %c0_4] : memref<64x2xf32, #tpu.memory_space<vmem>>, vector<64x2xf32>
    %cst_5 = arith.constant dense<0.000000e+00> : vector<16x2xf32>
    %4 = tpu.matmul %2, %3, %cst_5 {dimension_numbers = #tpu.dot_dimension_numbers<[1], [0], [0], [1], [0, 0, 1, 1], [], []>} : vector<16x64xf32>, vector<64x2xf32>, vector<16x2xf32> -> vector<16x2xf32>
    %c0_6 = arith.constant 0 : index
    %c0_7 = arith.constant 0 : index
    %5 = vector.load %arg5[%c0_6, %c0_7] : memref<16x2xf32, #tpu.memory_space<vmem>>, vector<16x2xf32>
    tpu.vector_store %arg5[%c0_6, %c0_7], %4 {strides = array<i32>} : memref<16x2xf32, #tpu.memory_space<vmem>>, vector<16x2xf32>,
    %c0_8 = arith.constant 0 : index
    %c0_9 = arith.constant 0 : index
    %6 = vector.load %arg4[%c0_8, %c0_9] : memref<16x64xf32, #tpu.memory_space<vmem>>, vector<16x64xf32>
    tpu.vector_store %arg4[%c0_8, %c0_9], %2 {strides = array<i32>} : memref<16x64xf32, #tpu.memory_space<vmem>>, vector<16x64xf32>,
    return
  }
  func.func @transform_0(%arg0: i32) -> (i32, i32) {
    %c0_i32 = arith.constant 0 : i32
    %c0_i32_0 = arith.constant 0 : i32
    return %arg0, %c0_i32 : i32, i32
  }
  func.func @transform_1(%arg0: i32) -> (i32, i32) {
    %c0_i32 = arith.constant 0 : i32
    %c0_i32_0 = arith.constant 0 : i32
    %c0_i32_1 = arith.constant 0 : i32
    return %c0_i32, %c0_i32_0 : i32, i32
  }
  func.func @transform_2(%arg0: i32) -> (i32, i32) {
    %c0_i32 = arith.constant 0 : i32
    %c0_i32_0 = arith.constant 0 : i32
    %c0_i32_1 = arith.constant 0 : i32
    return %c0_i32, %c0_i32_0 : i32, i32
  }
  func.func @transform_3(%arg0: i32) -> (i32, i32) {
    %c0_i32 = arith.constant 0 : i32
    %c0_i32_0 = arith.constant 0 : i32
    return %arg0, %c0_i32 : i32, i32
  }
  func.func @transform_4(%arg0: i32) -> (i32, i32) {
    %c0_i32 = arith.constant 0 : i32
    %c0_i32_0 = arith.constant 0 : i32
    return %arg0, %c0_i32 : i32, i32
  }
}

</mosaic_0001>

<bundles_post_ra>
// kernel: tpu_custom_call.1
= control target key start
LH: loop header
LB: loop body
LE: loop exit
PB: predicated region body
PF: predicated region fallthrough
CT: control target
= control target key end

     0   :  { %vm23_vm0 = vcmask 261120   ;;  %s411_s0 = inlined_call_operand.vmem [shape: f32[16,32], index: 0, kind: input, shape index: {}]   ;;  %s412_s1 = inlined_call_operand.vmem [shape: f32[32,64], index: 1, kind: input, shape index: {}]   ;;  %s413_s2 = inlined_call_operand.vmem [shape: f32[64,2], index: 2, kind: input, shape index: {}]   ;;  %s414_s3 = inlined_call_operand.hbm [shape: f32[16,64], index: 3, kind: output, shape index: {0}]   ;;  %s415_s4 = inlined_call_operand.vmem [shape: f32[16,2], index: 4, kind: output, shape index: {1}]  }
   0x1   :  { %v19_v0 = vld [vmem:[%s412_s1] sm:$0xff]  ;;  %v20_v1 = vld [vmem:[%s412_s1 + $0x8] sm:$0xff]  ;;  %v21_v2 = vld [vmem:[%s412_s1 + $0x10] sm:$0xff] }
   0x2   :  { %v270_v3 = vpack.c.bf16 %v20_v1, %v19_v0  ;;  %v22_v4 = vld [vmem:[%s412_s1 + $0x18] sm:$0xff]  ;;  %v17_v5 = vld [vmem:[%s411_s0] sm:$0xff]  ;;  %v106_v8 = vld [vmem:[%s413_s2 + $0x8] sm:$0xff] }
   0x3   :  { %v274_v6 = vpack.c.bf16 %v22_v4, %v21_v2  ;;  %248 = vmatprep.mubr.msk.f32.mxu0 %vm23_vm0, %v17_v5  ;;  %v105_v7 = vld [vmem:[%s413_s2] sm:$0xff]  ;;  %v107_v9 = vld [vmem:[%s413_s2 + $0x10] sm:$0xff]  ;;  %v108_v11 = vld [vmem:[%s413_s2 + $0x18] sm:$0xff] }
   0x4   :  { %271 = vmatprep.subr.bf16.mxu0 %v270_v3  ;;  %v278_v10 = vpack.c.bf16 %v106_v8, %v105_v7  ;;  %v282_v12 = vpack.c.bf16 %v108_v11, %v107_v9  ;;  %v109_v13 = vld [vmem:[%s413_s2 + $0x20] sm:$0xff]  ;;  %v110_v14 = vld [vmem:[%s413_s2 + $0x28] sm:$0xff] }
   0x5   :  { %273 = vmatpush3.bf16.msra.mxu0 %v270_v3 }
   0x6   :  { %10 = vsyncpa [#allocation3], 0  ;;  %275 = vmatprep.subr.bf16.mxu0 %v274_v6  ;;  %279 = vmatprep.subr.bf16.mxu1 %v278_v10  ;;  %v286_v15 = vpack.c.bf16 %v110_v14, %v109_v13  ;;  %v18_v16 = vld [vmem:[%s411_s0 + $0x8] sm:$0xff]  ;;  %v111_v17 = vld [vmem:[%s413_s2 + $0x30] sm:$0xff]  ;;  %vm113_vm1 = vcmask 523264   ;;  %s321_s0 = smov [#allocation2]  }
   0x7   :  { %281 = vmatpush3.bf16.msra.mxu1 %v278_v10  ;;  %v112_v18 = vld [vmem:[%s413_s2 + $0x38] sm:$0xff]  ;;  %s205_s16 = sshll.u32 %s321_s0, 4  ;;  %s206_s16 = int_to_ptr.vmem [resolvable:$true] %s205_s16 }
   0x8   :  { %283 = vmatprep.subr.bf16.mxu1 %v282_v12  ;;  %v290_v19 = vpack.c.bf16 %v112_v18, %v111_v17  ;;  %s297_s17 = scalar_lea.vmem %s206_s16, 256  ;;  %p302_p1 = scmp.lt.s32.totalorder %s206_s16, %s206_s16 }
   0x9   :  { %277 = vmatpush3.bf16.msra.mxu0 %v274_v6  ;;  %p298_p0 = scmp.ne.s32.totalorder %s206_s16, %s297_s17  ;;  %p303_p2 = scmp.lt.s32.totalorder %s297_s17, %s297_s17 }
   0xb   :  { %285 = vmatpush3.bf16.msra.mxu1 %v282_v12  ;;  %p304_p3 = por %p303_p2, %p302_p1 }
   0xc   :  { %249 = vmatmul.mubr.msk.f32.vlgmr.msra.gmra.mrb[0].mxu0 %vm23_vm0, %v18_v16  ;;  %287 = vmatprep.subr.bf16.mxu1 %v286_v15 }
   0xd   :  { %p305_p4 = pnand %p304_p3, %p298_p0 }
   0xf   :  { %289 = vmatpush3.bf16.msra.mxu1 %v286_v15 }
  0x10   :  { %291 = vmatprep.subr.bf16.mxu1 %v290_v19 }
  0x13   :  { %293 = vmatpush3.bf16.msra.mxu1 %v290_v19 }
  0xdf   :  { %v250_v20 = vpop.f32.mrb[0].mxu0 }
  0xe0   :  { %199 = vst.msk [vmem:[#allocation2 + $0x8] sm:$0xff] %vm113_vm1, %v250_v20  ;;  %v96_v21 = vpop.f32.mrb[1].mxu0 }
  0xe1   :  { %198 = vst.msk [vmem:[#allocation2] sm:$0xff] %vm113_vm1, %v96_v21  ;;  %267 = vmatprep.mubr.msk.f32.mxu1 %vm113_vm1, %v96_v21 }
  0xe2   :  { %268 = vmatmul.mubr.msk.f32.vlgmr.msra.gmra.mrb[0].mxu1 %vm113_vm1, %v250_v20 }
  0xe3   :  { %308 = shalt.err (!%p305_p4)
}
  0xe4   :  { %s309_s19 = scalar_lea.hbm %s414_s3, 256 }
  0xe5   :  { %p310_p5 = scmp.ne.s32.totalorder %s414_s3, %s309_s19  ;;  %p313_p6 = scmp.lt.u32.totalorder %s309_s19, %s414_s3 }
  0xe7   :  { %p315_p7 = pnand %p313_p6, %p310_p5 }
  0xe9   :  { %318 = shalt.err (!%p315_p7)
}
  0xea   :  { %s322_s24 = smov 128   ;;  %s323_s25 = smov 8   ;;  %vm195_vm2 = vcmask 15360  }
  0xeb   :  { %211 = dma.vmem_to_hbm [thread:$0]  %s206_s16, 256, %s414_s3, [#allocation3], %s322_s24, %s322_s24, %s323_s25  }
 0x1b5   :  { %v269_v22 = vpop.f32.mrb[0].mxu1 }
 0x1b6   :  { %197 = vst.msk [vmem:[%s415_s4 + $0x8] sm:$0xff] %vm195_vm2, %v269_v22  ;;  %v186_v23 = vpop.f32.mrb[1].mxu1 }
 0x1b7   :  { %196 = vst.msk [vmem:[%s415_s4] sm:$0xff] %vm195_vm2, %v186_v23 }
 0x1b8   :  { %319 = dma.done.wait [#allocation3], 256  }
 0x1b9   :  { %320 = vsyncadd [#allocation3], 4294967040 }
 0x1ba   :  { %219 = vsyncpa [#allocation3], 1 }

</bundles_post_ra>
